<compile_context>
chip_gen: v5e
topology: v5e:2x2
jax: 0.10.0
libtpu: 0.0.40
codegen_flags: <defaults>
</compile_context>

<pallas_src>
import functools

import jax
import jax.numpy as jnp
from jax import lax
from jax.experimental import pallas as pl
from jax.experimental.pallas import tpu as pltpu


def _heatmap_loss_kernel(inv_denom, total_rows, r_block, needs_mask,
                         pred_ref, gt_ref, out_ref, acc_ref):
    # pred_ref, gt_ref: (b_block, r_block, lane) lane-dense chunks in VMEM.
    # out_ref:          (b_block, 1) per-batch results, resident across chunks.
    # acc_ref:          (b_block, lane) f32 per-lane accumulator (VPU adds only).
    j = pl.program_id(1)
    last = pl.num_programs(1) - 1

    @pl.when(j == 0)
    def _():
        acc_ref[...] = jnp.zeros_like(acc_ref)

    d = pred_ref[...].astype(jnp.float32) - gt_ref[...].astype(jnp.float32)
    dd = d * d

    if needs_mask:
        # The last chunk overhangs the rows axis; Pallas pads the block with
        # undefined data, so zero those rows.  Only the last chunk pays for
        # the iota/compare/select; earlier chunks take the unmasked path.
        @pl.when(j == last)
        def _():
            row = lax.broadcasted_iota(jnp.int32, dd.shape, 1) + j * r_block
            acc_ref[...] += jnp.sum(jnp.where(row < total_rows, dd, 0.0), axis=1)

        @pl.when(j != last)
        def _():
            acc_ref[...] += jnp.sum(dd, axis=1)
    else:
        acc_ref[...] += jnp.sum(dd, axis=1)

    @pl.when(j == last)
    def _():
        out_ref[...] = (jnp.sum(acc_ref[...], axis=-1, keepdims=True)
                        * jnp.float32(inv_denom)).astype(out_ref.dtype)


def heatmap_loss(pred, ground_truth, *, max_rows_per_chunk=2048,
                 small_block_bytes=1 << 20, batch_block_target_bytes=2 << 20):
    """Pallas HeatmapLoss. pred, ground_truth: (N, C, H, W). Returns (N,) f32."""
    assert pred.shape == ground_truth.shape
    n, c, h, w = pred.shape
    chw = c * h * w
    itemsize = jnp.dtype(pred.dtype).itemsize

    # --- Lane-dense flattening without (usually) any padding. ---------------
    lane = next((l for l in (512, 256, 128) if chw % l == 0), 128)
    rows = pl.cdiv(chw, lane)
    padded_chw = rows * lane

    def _prep(x):
        x2 = x.reshape(n, chw)                       # free: NCHW is contiguous
        if padded_chw != chw:
            # Rare fallback (C*H*W not a multiple of 128).  Zero-pad both
            # inputs (zeros contribute 0 to the SSE); mean still uses 1/chw.
            x2 = jnp.pad(x2, ((0, 0), (0, padded_chw - chw)))
        return x2.reshape(n, rows, lane)

    p3 = _prep(pred)
    g3 = _prep(ground_truth)

    # --- Choose blocking. ----------------------------------------------------
    max_rows_per_chunk = max(8, (max_rows_per_chunk // 8) * 8)
    per_batch_bytes = rows * lane * itemsize

    if per_batch_bytes <= small_block_bytes:
        # Small heatmaps: pack several batch elements per step so each DMA is
        # large and per-step overhead is amortized.
        r_block, num_chunks = rows, 1
        b_block = min(n, max(1, batch_block_target_bytes // per_batch_bytes))
        while n % b_block:            # exact grid, no padded batch blocks
            b_block -= 1
    elif rows <= max_rows_per_chunk:
        b_block, r_block, num_chunks = 1, rows, 1
    else:
        b_block, r_block = 1, max_rows_per_chunk     # multiple of 8
        num_chunks = pl.cdiv(rows, r_block)

    needs_mask = (num_chunks > 1) and (rows % r_block != 0)

    block_in_bytes = b_block * r_block * lane * itemsize
    # 2 inputs x 2 pipeline buffers + headroom for scratch/output.
    vmem_limit = int(max(32 << 20, min(4 * block_in_bytes + (4 << 20), 48 << 20)))

    kernel = functools.partial(_heatmap_loss_kernel, 1.0 / float(chw), rows,
                               r_block, needs_mask)

    out = pl.pallas_call(
        kernel,
        out_shape=jax.ShapeDtypeStruct((n, 1), jnp.float32),
        grid_spec=pltpu.PrefetchScalarGridSpec(
            num_scalar_prefetch=0,
            grid=(n // b_block, num_chunks),
            in_specs=[
                pl.BlockSpec((b_block, r_block, lane), lambda i, j: (i, j, 0)),
                pl.BlockSpec((b_block, r_block, lane), lambda i, j: (i, j, 0)),
            ],
            out_specs=pl.BlockSpec((b_block, 1), lambda i, j: (i, 0)),
            scratch_shapes=[pltpu.VMEM((b_block, lane), jnp.float32)],
        ),
        compiler_params=pltpu.CompilerParams(
            dimension_semantics=("parallel", "arbitrary"),
            vmem_limit_bytes=vmem_limit,
        ),
    )(p3, g3)
    return out[:, 0]


def heatmap_loss_ref(pred, ground_truth):
    # Pure-JAX reference mirroring the PyTorch forward exactly.
    l = (pred.astype(jnp.float32) - ground_truth.astype(jnp.float32)) ** 2
    return l.mean(axis=3).mean(axis=2).mean(axis=1)


if __name__ == "__main__":
    key = jax.random.PRNGKey(0)

    # 1) Main small-shape check (small/batch-blocked path, lane=512).
    k1, k2, k3, k4, k5, k6 = jax.random.split(key, 6)
    N, C, H, W = 2, 4, 16, 16
    pred = jax.random.normal(k1, (N, C, H, W), dtype=jnp.float32)
    gt = jax.random.uniform(k2, (N, C, H, W), dtype=jnp.float32)
    out = jax.block_until_ready(heatmap_loss(pred, gt))
    ref = heatmap_loss_ref(pred, gt)
    assert out.shape == (N,)
    assert jnp.allclose(out, ref, atol=1e-5, rtol=1e-5), (out, ref)

    # 2) Chunked path with a ragged (masked) last chunk, small shapes by
    #    forcing tiny chunk/threshold parameters.
    pred2 = jax.random.normal(k3, (2, 4, 32, 40), dtype=jnp.float32)   # chw=5120, rows=10
    gt2 = jax.random.uniform(k4, (2, 4, 32, 40), dtype=jnp.float32)
    out2 = jax.block_until_ready(
        heatmap_loss(pred2, gt2, max_rows_per_chunk=8, small_block_bytes=0))
    ref2 = heatmap_loss_ref(pred2, gt2)
    assert jnp.allclose(out2, ref2, atol=1e-5, rtol=1e-5), (out2, ref2)

    # 3) Rare pad-fallback path (C*H*W not a multiple of 128).
    pred3 = jax.random.normal(k5, (2, 3, 5, 7), dtype=jnp.float32)     # chw=105
    gt3 = jax.random.uniform(k6, (2, 3, 5, 7), dtype=jnp.float32)
    out3 = jax.block_until_ready(heatmap_loss(pred3, gt3))
    ref3 = heatmap_loss_ref(pred3, gt3)
    assert jnp.allclose(out3, ref3, atol=1e-5, rtol=1e-5), (out3, ref3)

    print("KERNEL_OK")
</pallas_src>

<mosaic_0001>
module attributes {stable_mosaic.version = 11 : i64} {
  func.func @_heatmap_loss_kernel(%arg0: i32, %arg1: i32, %arg2: memref<2x2x512xf32, #tpu.memory_space<vmem>>, %arg3: memref<2x2x512xf32, #tpu.memory_space<vmem>>, %arg4: memref<2x1xf32, #tpu.memory_space<vmem>>, %arg5: memref<2x512xf32, #tpu.memory_space<vmem>>) attributes {dimension_semantics = [#tpu.dimension_semantics<parallel>, #tpu.dimension_semantics<arbitrary>], iteration_bounds = array<i64: 1, 1>, scalar_prefetch = 0 : i64, scratch_operands = 1 : i64, tpu.core_type = #tpu.core_type<tc>, window_params = [{transform_indices = @transform_0, window_bounds = array<i64: 2, 2, 512>}, {transform_indices = @transform_1, window_bounds = array<i64: 2, 2, 512>}, {transform_indices = @transform_2, window_bounds = array<i64: 2, 1>}]} {
    %c0_i32 = arith.constant 0 : i32
    %0 = arith.cmpi eq, %arg1, %c0_i32 : i32
    %1 = arith.extui %0 : i1 to i32
    %c0_i32_0 = arith.constant 0 : i32
    %2 = arith.cmpi ne, %1, %c0_i32_0 : i32
    scf.if %2 {
      %cst_12 = arith.constant 0.000000e+00 : f32
      %14 = vector.broadcast %cst_12 : f32 to vector<2x512xf32>
      %c0_13 = arith.constant 0 : index
      %c0_14 = arith.constant 0 : index
      %15 = vector.load %arg5[%c0_13, %c0_14] : memref<2x512xf32, #tpu.memory_space<vmem>>, vector<2x512xf32>
      tpu.vector_store %arg5[%c0_13, %c0_14], %14 {strides = array<i32>} : memref<2x512xf32, #tpu.memory_space<vmem>>, vector<2x512xf32>,
    } else {
    }
    %c0 = arith.constant 0 : index
    %c0_1 = arith.constant 0 : index
    %c0_2 = arith.constant 0 : index
    %3 = vector.load %arg2[%c0, %c0_1, %c0_2] : memref<2x2x512xf32, #tpu.memory_space<vmem>>, vector<2x2x512xf32>
    %c0_3 = arith.constant 0 : index
    %c0_4 = arith.constant 0 : index
    %c0_5 = arith.constant 0 : index
    %4 = vector.load %arg3[%c0_3, %c0_4, %c0_5] : memref<2x2x512xf32, #tpu.memory_space<vmem>>, vector<2x2x512xf32>
    %5 = arith.subf %3, %4 : vector<2x2x512xf32>
    %6 = arith.mulf %5, %5 : vector<2x2x512xf32>
    %c0_6 = arith.constant 0 : index
    %c0_7 = arith.constant 0 : index
    %7 = vector.load %arg5[%c0_6, %c0_7] : memref<2x512xf32, #tpu.memory_space<vmem>>, vector<2x512xf32>
    %cst = arith.constant dense<0.000000e+00> : vector<2x512xf32>
    %8 = vector.multi_reduction <add>, %6, %cst [1] : vector<2x2x512xf32> to vector<2x512xf32>
    %9 = arith.addf %7, %8 : vector<2x512xf32>
    %c0_8 = arith.constant 0 : index
    %c0_9 = arith.constant 0 : index
    %10 = vector.load %arg5[%c0_8, %c0_9] : memref<2x512xf32, #tpu.memory_space<vmem>>, vector<2x512xf32>
    tpu.vector_store %arg5[%c0_8, %c0_9], %9 {strides = array<i32>} : memref<2x512xf32, #tpu.memory_space<vmem>>, vector<2x512xf32>,
    %c0_i32_10 = arith.constant 0 : i32
    %11 = arith.cmpi eq, %arg1, %c0_i32_10 : i32
    %12 = arith.extui %11 : i1 to i32
    %c0_i32_11 = arith.constant 0 : i32
    %13 = arith.cmpi ne, %12, %c0_i32_11 : i32
    scf.if %13 {
      %c0_12 = arith.constant 0 : index
      %c0_13 = arith.constant 0 : index
      %14 = vector.load %arg5[%c0_12, %c0_13] : memref<2x512xf32, #tpu.memory_space<vmem>>, vector<2x512xf32>
      %cst_14 = arith.constant dense<0.000000e+00> : vector<2xf32>
      %15 = vector.multi_reduction <add>, %14, %cst_14 [1] : vector<2x512xf32> to vector<2xf32>
      %16 = vector.shape_cast %15 : vector<2xf32> to vector<2x1xf32>
      %cst_15 = arith.constant 9.765625E-4 : f32
      %17 = vector.broadcast %cst_15 : f32 to vector<2x1xf32>
      %18 = arith.mulf %16, %17 : vector<2x1xf32>
      %c0_16 = arith.constant 0 : index
      %c0_17 = arith.constant 0 : index
      %19 = vector.load %arg4[%c0_16, %c0_17] : memref<2x1xf32, #tpu.memory_space<vmem>>, vector<2x1xf32>
      tpu.vector_store %arg4[%c0_16, %c0_17], %18 {strides = array<i32>} : memref<2x1xf32, #tpu.memory_space<vmem>>, vector<2x1xf32>,
    } else {
    }
    return
  }
  func.func @transform_0(%arg0: i32, %arg1: i32) -> (i32, i32, i32) {
    %c0_i32 = arith.constant 0 : i32
    %c0_i32_0 = arith.constant 0 : i32
    return %arg0, %arg1, %c0_i32 : i32, i32, i32
  }
  func.func @transform_1(%arg0: i32, %arg1: i32) -> (i32, i32, i32) {
    %c0_i32 = arith.constant 0 : i32
    %c0_i32_0 = arith.constant 0 : i32
    return %arg0, %arg1, %c0_i32 : i32, i32, i32
  }
  func.func @transform_2(%arg0: i32, %arg1: i32) -> (i32, i32) {
    %c0_i32 = arith.constant 0 : i32
    %c0_i32_0 = arith.constant 0 : i32
    return %arg0, %c0_i32 : i32, i32
  }
}

</mosaic_0001>

<bundles_post_ra>
// kernel: tpu_custom_call.1
= control target key start
LH: loop header
LB: loop body
LE: loop exit
PB: predicated region body
PF: predicated region fallthrough
CT: control target
= control target key end

     0   :  { %7 = vsyncpa [#allocation4], 0  ;;  %s303_s0 = inlined_call_operand.hbm [shape: f32[2,2,512], index: 0, kind: input, shape index: {}]   ;;  %s304_s1 = inlined_call_operand.hbm [shape: f32[2,2,512], index: 1, kind: input, shape index: {}]   ;;  %s305_s2 = inlined_call_operand.vmem [shape: f32[2,1], index: 2, kind: output, shape index: {}]  }
   0x1   :  { %s13_s11 = sshll.u32 %s303_s0, 4  ;;  %s14_s11 = int_to_ptr.hbm [resolvable:$true] %s13_s11 }
   0x2   :  { %8 = vsyncpa [#allocation6], 0  ;;  %s261_s12 = smov [#allocation3]   ;;  %s26_s16 = sshll.u32 %s304_s1, 4  ;;  %s27_s16 = int_to_ptr.hbm [resolvable:$true] %s26_s16 }
   0x3   :  { %s15_s13 = sshll.u32 %s261_s12, 4  ;;  %s262_s17 = smov 128   ;;  %s16_s13 = int_to_ptr.vmem [resolvable:$true] %s15_s13 }
   0x4   :  { %s263_s18 = smov 8   ;;  %s264_s19 = smov [#allocation5]  }
   0x5   :  { %21 = dma.hbm_to_vmem [thread:$0]  %s14_s11, 256, %s16_s13, [#allocation4], %s262_s17, %s262_s17, %s263_s18  }
   0x6   :  { %s28_s20 = sshll.u32 %s264_s19, 4  ;;  %s29_s20 = int_to_ptr.vmem [resolvable:$true] %s28_s20 }
   0x7   :  { %34 = dma.hbm_to_vmem [thread:$0]  %s27_s16, 256, %s29_s20, [#allocation6], %s262_s17, %s262_s17, %s263_s18  }
   0x8   :  { %257 = dma.done.wait [#allocation4], 256  }
   0x9   :  { %258 = vsyncadd [#allocation4], 4294967040 }
   0xa   :  { %259 = dma.done.wait [#allocation6], 256  }
   0xb   :  { %260 = vsyncadd [#allocation6], 4294967040  ;;  %v48_v0 = vld [vmem:[#allocation3] sm:$0xff]  ;;  %v49_v1 = vld [vmem:[#allocation3 + $0x8] sm:$0xff]  ;;  %vm78_vm0 = vcmask 1041408   ;;  %vm150_vm1 = vcmask 1045508  }
   0xc   :  { %v50_v2 = vld [vmem:[#allocation5] sm:$0xff]  ;;  %v51_v3 = vld [vmem:[#allocation5 + $0x8] sm:$0xff]  ;;  %vm152_vm2 = vcmask 1043456   ;;  %vm162_vm3 = vcmask 1041409   ;;  %vm164_vm4 = vcmask 1043459   ;;  %vm166_vm5 = vcmask 1045509  }
   0xd   :  { %v52_v4 = vsub.f32 %v48_v0, %v50_v2  ;;  %v53_v5 = vsub.f32 %v49_v1, %v51_v3  ;;  %vm168_vm6 = vcmask 1047559   ;;  %vm197_vm7 = vcmask 1024  }
   0xf   :  { %v54_v6 = vmul.f32 %v52_v4, %v52_v4  ;;  %v55_v7 = vmul.f32 %v53_v5, %v53_v5 }
  0x11   :  { %59 = vst [vmem:[#allocation1] ss:$4 sm:$0xff] %v54_v6 }
  0x12   :  { %65 = vst [vmem:[#allocation1 + $0x20] ss:$4 sm:$0xff] %v55_v7 }
  0x18   :  { %v60_v8 = vld.sshfl [vmem:[#allocation1] sm:$0xff pattern:$0x73625140]  ;;  %v61_v9 = vld.sshfl [vmem:[#allocation1 + $0x8] sm:$0xff pattern:$0x73625140] }
  0x19   :  { %v62_v10 = vld.sshfl [vmem:[#allocation1 + $0x10] sm:$0xff pattern:$0x73625140]  ;;  %v63_v11 = vld.sshfl [vmem:[#allocation1 + $0x18] sm:$0xff pattern:$0x73625140] }
  0x1a   :  { %v66_v12 = vld.sshfl [vmem:[#allocation1 + $0x20] sm:$0xff pattern:$0x73625140]  ;;  %v67_v13 = vld.sshfl [vmem:[#allocation1 + $0x28] sm:$0xff pattern:$0x73625140] }
  0x1b   :  { %v68_v14 = vld.sshfl [vmem:[#allocation1 + $0x30] sm:$0xff pattern:$0x73625140]  ;;  %v69_v15 = vld.sshfl [vmem:[#allocation1 + $0x38] sm:$0xff pattern:$0x73625140] }
  0x1c   :  { %v79_v16 = vsel %vm78_vm0, %v60_v8, 0.0  ;;  %v86_v17 = vsel %vm78_vm0, %v61_v9, 0.0  ;;  %v93_v18 = vsel %vm78_vm0, %v62_v10, 0.0  ;;  %v100_v19 = vsel %vm78_vm0, %v63_v11, 0.0 }
  0x1d   :  { %v80_v20 = vrot.slane %v79_v16, 4  ;;  %v87_v21 = vrot.slane %v86_v17, 4  ;;  %v94_v22 = vrot.slane %v93_v18, 4  ;;  %v101_v23 = vrot.slane %v100_v19, 4 }
  0x1e   :  { %v107_v24 = vsel %vm78_vm0, %v66_v12, 0.0  ;;  %v114_v25 = vsel %vm78_vm0, %v67_v13, 0.0  ;;  %v121_v26 = vsel %vm78_vm0, %v68_v14, 0.0  ;;  %v128_v27 = vsel %vm78_vm0, %v69_v15, 0.0 }
  0x1f   :  { %v81_v28 = vadd.f32 %v80_v20, %v79_v16  ;;  %v88_v29 = vadd.f32 %v87_v21, %v86_v17  ;;  %v95_v30 = vadd.f32 %v94_v22, %v93_v18  ;;  %v102_v31 = vadd.f32 %v101_v23, %v100_v19 }
  0x20   :  { %v108_v32 = vrot.slane %v107_v24, 4  ;;  %v115_v33 = vrot.slane %v114_v25, 4  ;;  %v122_v34 = vrot.slane %v121_v26, 4  ;;  %v129_v35 = vrot.slane %v128_v27, 4 }
  0x21   :  { %v82_v36 = vrot.slane %v81_v28, 2  ;;  %v89_v37 = vrot.slane %v88_v29, 2  ;;  %v96_v38 = vrot.slane %v95_v30, 2  ;;  %v103_v39 = vrot.slane %v102_v31, 2 }
  0x22   :  { %v109_v40 = vadd.f32 %v108_v32, %v107_v24  ;;  %v116_v41 = vadd.f32 %v115_v33, %v114_v25  ;;  %v123_v42 = vadd.f32 %v122_v34, %v121_v26  ;;  %v130_v43 = vadd.f32 %v129_v35, %v128_v27 }
  0x23   :  { %v83_v44 = vadd.f32 %v82_v36, %v81_v28  ;;  %v90_v45 = vadd.f32 %v89_v37, %v88_v29  ;;  %v97_v46 = vadd.f32 %v96_v38, %v95_v30  ;;  %v104_v47 = vadd.f32 %v103_v39, %v102_v31 }
  0x24   :  { %v110_v48 = vrot.slane %v109_v40, 2  ;;  %v117_v49 = vrot.slane %v116_v41, 2  ;;  %v124_v50 = vrot.slane %v123_v42, 2  ;;  %v131_v51 = vrot.slane %v130_v43, 2 }
  0x25   :  { %v84_v52 = vrot.slane %v83_v44, 1  ;;  %v91_v53 = vrot.slane %v90_v45, 1  ;;  %v98_v54 = vrot.slane %v97_v46, 1  ;;  %v105_v55 = vrot.slane %v104_v47, 1 }
  0x26   :  { %v111_v56 = vadd.f32 %v110_v48, %v109_v40  ;;  %v118_v57 = vadd.f32 %v117_v49, %v116_v41  ;;  %v125_v58 = vadd.f32 %v124_v50, %v123_v42  ;;  %v132_v59 = vadd.f32 %v131_v51, %v130_v43 }
  0x27   :  { %v85_v60 = vadd.f32 %v84_v52, %v83_v44  ;;  %v92_v61 = vadd.f32 %v91_v53, %v90_v45  ;;  %v99_v62 = vadd.f32 %v98_v54, %v97_v46  ;;  %v106_v63 = vadd.f32 %v105_v55, %v104_v47 }
  0x28   :  { %v112_v0 = vrot.slane %v111_v56, 1  ;;  %v119_v1 = vrot.slane %v118_v57, 1  ;;  %v126_v2 = vrot.slane %v125_v58, 1  ;;  %v133_v3 = vrot.slane %v132_v59, 1 }
  0x29   :  { %v143_v4 = vrot.slane %v92_v61, 6  ;;  %v144_v5 = vrot.slane %v99_v62, 4  ;;  %v145_v6 = vrot.slane %v106_v63, 2 }
  0x2a   :  { %v113_v7 = vadd.f32 %v112_v0, %v111_v56  ;;  %v120_v8 = vadd.f32 %v119_v1, %v118_v57  ;;  %v127_v9 = vadd.f32 %v126_v2, %v125_v58  ;;  %v134_v10 = vadd.f32 %v133_v3, %v132_v59 }
  0x2b   :  { %v149_v11 = vsel %vm78_vm0, %v85_v60, %v143_v4  ;;  %v151_v15 = vsel %vm150_vm1, %v144_v5, %v145_v6 }
  0x2c   :  { %v146_v12 = vrot.slane %v120_v8, 6  ;;  %v147_v13 = vrot.slane %v127_v9, 4  ;;  %v148_v14 = vrot.slane %v134_v10, 2  ;;  %v153_v18 = vsel %vm152_vm2, %v149_v11, %v151_v15 }
  0x2e   :  { %v154_v16 = vsel %vm78_vm0, %v113_v7, %v146_v12  ;;  %v155_v17 = vsel %vm150_vm1, %v147_v13, %v148_v14 }
  0x2f   :  { %v156_v19 = vsel %vm152_vm2, %v154_v16, %v155_v17 }
  0x30   :  { %v161_v20 = vrot.slane %v156_v19, 7 }
  0x32   :  { %v163_v21 = vsel %vm162_vm3, %v161_v20, %v153_v18 }
  0x33   :  { %v165_v22 = vsel %vm164_vm4, %v161_v20, %v163_v21 }
  0x34   :  { %v167_v23 = vsel %vm166_vm5, %v161_v20, %v165_v22 }
  0x35   :  { %v169_v24 = vsel %vm168_vm6, %v161_v20, %v167_v23 }
  0x36   :  { %178 = vst [vmem:[#allocation1] ss:$4 sm:$0xff] %v169_v24 }
  0x3d   :  { %v179_v25 = vld.sshfl [vmem:[#allocation1] sm:$0xff pattern:$0x73625140]  ;;  %v180_v26 = vld.sshfl [vmem:[#allocation1 + $0x8] sm:$0xff pattern:$0x73625140] }
  0x3e   :  { %v181_v27 = vld.sshfl [vmem:[#allocation1 + $0x10] sm:$0xff pattern:$0x73625140]  ;;  %v182_v28 = vld.sshfl [vmem:[#allocation1 + $0x18] sm:$0xff pattern:$0x73625140] }
  0x3f   :  { %v187_v29 = vsel %vm78_vm0, %v179_v25, 0.0  ;;  %v188_v30 = vsel %vm78_vm0, %v180_v26, 0.0  ;;  %v190_v31 = vsel %vm78_vm0, %v181_v27, 0.0  ;;  %v192_v33 = vsel %vm78_vm0, %v182_v28, 0.0 }
  0x40   :  { %v189_v32 = vadd.f32 %v188_v30, %v187_v29 }
  0x42   :  { %v191_v34 = vadd.f32 %v190_v31, %v189_v32 }
  0x44   :  { %v193_v35 = vadd.f32 %v192_v33, %v191_v34 }
  0x46   :  { %194 = vadd.xlane.f32.xlu0 %v193_v35 }
  0xb9   :  { %v195_v36 = vpop.xlane.xlu0 %194 }
  0xba   :  { %v196_v37 = vmul.f32 0.0009765625, %v195_v36 }
  0xbc   :  { %198 = vst.msk [vmem:[%s305_s2] sm:$0x3] %vm197_vm7, %v196_v37 }
  0xbd   :  { %203 = vsyncpa [#allocation4], 1 }
  0xbe   :  { %204 = vsyncpa [#allocation6], 1 }

</bundles_post_ra>
